<compile_context>
chip_gen: v5e
topology: v5e:2x2
jax: 0.10.0
libtpu: 0.0.40
codegen_flags: <defaults>
</compile_context>

<pallas_src>
import functools

import jax
import jax.numpy as jnp
import numpy as np
from jax.experimental import pallas as pl
from jax.experimental.pallas import tpu as pltpu


# ----------------------------- configuration -------------------------------
class Config:
    attention_hidden_size = 32   # A
    lstm_hidden_size = 32        # L


class Extractor:
    nfeatures = 4                # C  (channels of the feature map)
    hfeatures = 4                # H
    wfeatures = 8                # W


# --------------------------- packed-param layout ----------------------------
def _round_up(x, m=8):
    return (x + m - 1) // m * m


def _param_offsets(C, L, HW):
    """Row offsets of each parameter inside the packed (total, A) slab.

    Every section starts at a multiple of 8 rows (sublane-aligned), so the
    in-kernel static slices are clean sublane-tile reads.
    """
    o_wf = 0                                 # Wf^T : (C, A)
    o_ws = _round_up(C)                      # Ws^T : (L, A)
    o_pos = o_ws + _round_up(L)              # pos  : (HW, A)
    o_wm = o_pos + _round_up(HW)             # wm   : (1, A)
    total = o_wm + _round_up(1)
    return o_wf, o_ws, o_pos, o_wm, total


# ------------------------------- kernel ------------------------------------
def attention_kernel(feat_ref, hid_ref, par_ref, out_ref):
    """One grid step processes a whole batch tile.

    feat_ref : (bb, C, HW)       features in C-major layout (free reshape of NCHW)
    hid_ref  : (bb, L)           lstm hidden state
    par_ref  : (80, A)           packed params: [Wf^T | pad | Ws^T | pos | wm | pad]
    out_ref  : (bb, HW + C)      packed outputs: mask (lanes 0:HW) || context (HW:HW+C)
    """
    bb, C, HW = feat_ref.shape
    L = hid_ref.shape[1]
    A = par_ref.shape[1]
    o_wf, o_ws, o_pos, o_wm, _ = _param_offsets(C, L, HW)

    # Static, sublane-aligned slices of the single packed-parameter DMA.
    wf_t = par_ref[o_wf:o_wf + C, :]        # (C, A)   linear_feature weight^T
    ws_t = par_ref[o_ws:o_ws + L, :]        # (L, A)   linear_state weight^T
    pos = par_ref[o_pos:o_pos + HW, :]      # (HW, A)  precomputed wex + wey
    wm = par_ref[o_wm:o_wm + 1, :]          # (1, A)   linear_mask weight

    feat_chw = feat_ref[...]                                 # (bb, C, HW), HW lane-dense
    # Tiny in-kernel transpose (C=4 x HW=32 per batch) instead of a wrapper-side
    # NCHW->NHWC transpose that would double feature HBM traffic.
    feat_hwc = jnp.transpose(feat_chw, (0, 2, 1))            # (bb, HW, C)

    # linear_feature(features): one batched MXU contraction (no reshape round trip).
    wf = jnp.einsum('bhc,bca->bha', feat_hwc,
                    jnp.broadcast_to(wf_t, (bb, C, A)),
                    preferred_element_type=jnp.float32)      # (bb, HW, A)

    # linear_state(hidden_state): single small matmul for the whole batch tile.
    ws = jnp.dot(hid_ref[...], ws_t,
                 preferred_element_type=jnp.float32)         # (bb, A)

    # tanh(wf + wex + wey + ws)
    t = jnp.tanh(wf + pos + ws[:, None, :])                  # (bb, HW, A)

    # linear_mask(.) -> lane-dense scores (bb, HW); softmax along the lane axis.
    scores = jnp.sum(t * wm, axis=-1)                        # (bb, HW)
    m = jnp.max(scores, axis=-1, keepdims=True)
    e = jnp.exp(scores - m)
    mask = e / jnp.sum(e, axis=-1, keepdims=True)            # exact softmax (no approx rcp)

    # context = sum over spatial positions of features * mask (HW on lanes in both).
    ctx = jnp.sum(feat_chw * mask[:, None, :], axis=-1)      # (bb, C)

    # Packed output slab: a single output block / single output DMA.
    out_ref[:, 0:HW] = mask
    out_ref[:, HW:HW + C] = ctx


# ---------------------------- one-time init ---------------------------------
def prepare_attention(params, *, H, W):
    """Hoist parameter-only work out of the per-call path and pack it.

    pos = x_encoding @ Wx^T + y_encoding @ Wy^T  (shape (HW, A)) is precomputed,
    and all four parameter tensors are stacked into ONE (80, A) array so the
    kernel issues a single parameter DMA.
    """
    HW = H * W
    A, C = params["linear_feature"].shape
    L = params["linear_state"].shape[1]

    x_enc = jnp.tile(jnp.eye(W, dtype=jnp.float32), (H, 1))                 # (HW, W)
    y_enc = jnp.tile(jnp.eye(H, dtype=jnp.float32), (1, W)).reshape(HW, H)  # (HW, H)
    pos = (x_enc @ params["linear_x_encoding"].T.astype(jnp.float32)
           + y_enc @ params["linear_y_encoding"].T.astype(jnp.float32))     # (HW, A)

    o_wf, o_ws, o_pos, o_wm, total = _param_offsets(C, L, HW)
    packed = jnp.zeros((total, A), jnp.float32)
    packed = packed.at[o_wf:o_wf + C].set(params["linear_feature"].T.astype(jnp.float32))
    packed = packed.at[o_ws:o_ws + L].set(params["linear_state"].T.astype(jnp.float32))
    packed = packed.at[o_pos:o_pos + HW].set(pos)
    packed = packed.at[o_wm:o_wm + 1].set(params["linear_mask"].astype(jnp.float32))
    return {"packed": packed}


# ------------------------------- wrapper ------------------------------------
def attention_forward(hidden_state, features, prepared, *, H, W, batch_block=None):
    """features: (B, C, H, W) NCHW; hidden_state: (B, L).

    Default is one grid step for the whole batch (amortizes the ~0.35us/step
    overhead; params DMA'd once).  For large batches on v7x pass a batch_block
    that gives >=2 "parallel" blocks per TensorCore so BlockSpec double-buffering
    overlaps DMA with compute, and size it against the 2*bb*(HW*C + L)*4B +
    params + 2*bb*(HW+C)*4B VMEM budget (v7x: 64 MiB physical).  batch_block
    must be B or a multiple of 8.
    """
    B, C = features.shape[0], features.shape[1]
    L = hidden_state.shape[1]
    HW = H * W
    packed = prepared["packed"]
    R, A = packed.shape

    bb = B if batch_block is None else batch_block
    assert B % bb == 0, "batch_block must divide the batch size"
    nb = B // bb

    # Free reshape of NCHW (no transpose, no extra HBM traffic, no extra dispatch).
    feat = features.reshape(B, C, HW)

    out = pl.pallas_call(
        attention_kernel,
        out_shape=jax.ShapeDtypeStruct((B, HW + C), jnp.float32),
        grid_spec=pltpu.PrefetchScalarGridSpec(
            num_scalar_prefetch=0,
            grid=(nb,),
            in_specs=[
                pl.BlockSpec((bb, C, HW), lambda i: (i, 0, 0)),   # features (C-major)
                pl.BlockSpec((bb, L), lambda i: (i, 0)),          # hidden state
                pl.BlockSpec((R, A), lambda i: (0, 0)),           # packed params (1 DMA)
            ],
            out_specs=pl.BlockSpec((bb, HW + C), lambda i: (i, 0)),  # mask || ctx (1 DMA)
        ),
        compiler_params=pltpu.CompilerParams(
            dimension_semantics=("parallel",)),
    )(feat, hidden_state, packed)

    mask = out[:, :HW].reshape(B, H, W, 1)
    ctx = out[:, HW:]
    return ctx, mask


# ----------------------------- pure-JAX reference ---------------------------
def attention_reference(hidden_state, features, params, *, H, W):
    B, C = features.shape[0], features.shape[1]
    HW = H * W
    feat = jnp.transpose(features, (0, 2, 3, 1)).reshape(B, HW, C)
    wf = feat @ params["linear_feature"].T
    ws = (hidden_state @ params["linear_state"].T)[:, None, :]
    x_enc = jnp.tile(jnp.eye(W, dtype=jnp.float32), (H, 1))
    y_enc = jnp.tile(jnp.eye(H, dtype=jnp.float32), (1, W)).reshape(HW, H)
    wex = x_enc @ params["linear_x_encoding"].T
    wey = y_enc @ params["linear_y_encoding"].T
    scores = jnp.tanh(wf + wex + wey + ws) @ params["linear_mask"].T      # (B, HW, 1)
    mask = jax.nn.softmax(scores, axis=1)
    ctx = jnp.sum(feat * mask, axis=1)
    return ctx, mask.reshape(B, H, W, 1)


# --------------------------------- main -------------------------------------
if __name__ == "__main__":
    B = 2
    C = Extractor.nfeatures
    H = Extractor.hfeatures
    W = Extractor.wfeatures
    A = Config.attention_hidden_size
    L = Config.lstm_hidden_size

    key = jax.random.PRNGKey(0)
    k1, k2, k3, k4, k5, k6, k7 = jax.random.split(key, 7)

    # Deterministic parameters (torch Linear weight layout: (out_features, in_features)).
    params = {
        "linear_feature":    0.1 * jax.random.normal(k1, (A, C), jnp.float32),
        "linear_state":      0.1 * jax.random.normal(k2, (A, L), jnp.float32),
        "linear_x_encoding": 0.1 * jax.random.normal(k3, (A, W), jnp.float32),
        "linear_y_encoding": 0.1 * jax.random.normal(k4, (A, H), jnp.float32),
        "linear_mask":       0.1 * jax.random.normal(k5, (1, A), jnp.float32),
    }

    features = jax.random.normal(k6, (B, C, H, W), jnp.float32)      # NCHW
    hidden_state = jax.random.normal(k7, (B, L), jnp.float32)

    # One-time init: positional encoding + packed-parameter slab.
    prepared = prepare_attention(params, H=H, W=W)

    fwd = jax.jit(functools.partial(attention_forward, H=H, W=W))
    ctx, mask = fwd(hidden_state, features, prepared)
    jax.block_until_ready((ctx, mask))

    ctx_ref, mask_ref = attention_reference(hidden_state, features, params, H=H, W=W)
    np.testing.assert_allclose(np.asarray(ctx), np.asarray(ctx_ref), rtol=1e-4, atol=1e-5)
    np.testing.assert_allclose(np.asarray(mask), np.asarray(mask_ref), rtol=1e-4, atol=1e-5)

    print("KERNEL_OK")
</pallas_src>

<mosaic_0001>
module attributes {stable_mosaic.version = 11 : i64} {
  func.func @attention_kernel(%arg0: i32, %arg1: memref<2x4x32xf32, #tpu.memory_space<vmem>>, %arg2: memref<2x32xf32, #tpu.memory_space<vmem>>, %arg3: memref<80x32xf32, #tpu.memory_space<vmem>>, %arg4: memref<2x36xf32, #tpu.memory_space<vmem>>) attributes {dimension_semantics = [#tpu.dimension_semantics<parallel>], iteration_bounds = array<i64: 1>, scalar_prefetch = 0 : i64, scratch_operands = 0 : i64, tpu.core_type = #tpu.core_type<tc>, window_params = [{transform_indices = @transform_0, window_bounds = array<i64: 2, 4, 32>}, {transform_indices = @transform_1, window_bounds = array<i64: 2, 32>}, {pipeline_mode = #tpu.pipeline_mode<synchronous>, transform_indices = @transform_2, window_bounds = array<i64: 80, 32>}, {transform_indices = @transform_3, window_bounds = array<i64: 2, 36>}]} {
    %c0 = arith.constant 0 : index
    %c0_0 = arith.constant 0 : index
    %0 = vector.load %arg3[%c0, %c0_0] : memref<80x32xf32, #tpu.memory_space<vmem>>, vector<4x32xf32>
    %c8 = arith.constant 8 : index
    %c0_1 = arith.constant 0 : index
    %1 = vector.load %arg3[%c8, %c0_1] : memref<80x32xf32, #tpu.memory_space<vmem>>, vector<32x32xf32>
    %c40 = arith.constant 40 : index
    %c0_2 = arith.constant 0 : index
    %2 = vector.load %arg3[%c40, %c0_2] : memref<80x32xf32, #tpu.memory_space<vmem>>, vector<32x32xf32>
    %c72 = arith.constant 72 : index
    %c0_3 = arith.constant 0 : index
    %3 = vector.load %arg3[%c72, %c0_3] : memref<80x32xf32, #tpu.memory_space<vmem>>, vector<1x32xf32>
    %c0_4 = arith.constant 0 : index
    %c0_5 = arith.constant 0 : index
    %c0_6 = arith.constant 0 : index
    %4 = vector.load %arg1[%c0_4, %c0_5, %c0_6] : memref<2x4x32xf32, #tpu.memory_space<vmem>>, vector<2x4x32xf32>
    %5 = tpu.transpose %4, [0, 2, 1] : vector<2x4x32xf32> -> vector<2x32x4xf32>
    %6 = vector.shape_cast %0 : vector<4x32xf32> to vector<1x4x32xf32>
    %7 = vector.broadcast %6 : vector<1x4x32xf32> to vector<2x4x32xf32>
    "tpu.trace_start"() <{level = 10 : i32, message = "bhc,bca->bha"}> : () -> ()
    %cst = arith.constant dense<0.000000e+00> : vector<2x32x32xf32>
    %8 = tpu.matmul %5, %7, %cst {dimension_numbers = #tpu.dot_dimension_numbers<[2], [1], [1], [2], [0, 0, 0, 1, 1, 2], [0], [0]>} : vector<2x32x4xf32>, vector<2x4x32xf32>, vector<2x32x32xf32> -> vector<2x32x32xf32>
    "tpu.trace_stop"() : () -> ()
    %c0_7 = arith.constant 0 : index
    %c0_8 = arith.constant 0 : index
    %9 = vector.load %arg2[%c0_7, %c0_8] : memref<2x32xf32, #tpu.memory_space<vmem>>, vector<2x32xf32>
    %cst_9 = arith.constant dense<0.000000e+00> : vector<2x32xf32>
    %10 = tpu.matmul %9, %1, %cst_9 {dimension_numbers = #tpu.dot_dimension_numbers<[1], [0], [0], [1], [0, 0, 1, 1], [], []>} : vector<2x32xf32>, vector<32x32xf32>, vector<2x32xf32> -> vector<2x32xf32>
    %11 = vector.shape_cast %2 : vector<32x32xf32> to vector<1x32x32xf32>
    %12 = vector.broadcast %11 : vector<1x32x32xf32> to vector<2x32x32xf32>
    %13 = arith.addf %8, %12 : vector<2x32x32xf32>
    %14 = vector.shape_cast %10 : vector<2x32xf32> to vector<2x1x32xf32>
    %15 = vector.broadcast %14 : vector<2x1x32xf32> to vector<2x32x32xf32>
    %16 = arith.addf %13, %15 : vector<2x32x32xf32>
    %17 = math.tanh %16 : vector<2x32x32xf32>
    %18 = vector.shape_cast %3 : vector<1x32xf32> to vector<1x1x32xf32>
    %19 = vector.broadcast %18 : vector<1x1x32xf32> to vector<2x32x32xf32>
    %20 = arith.mulf %17, %19 : vector<2x32x32xf32>
    %cst_10 = arith.constant dense<0.000000e+00> : vector<2x32xf32>
    %21 = vector.multi_reduction <add>, %20, %cst_10 [2] : vector<2x32x32xf32> to vector<2x32xf32>
    %cst_11 = arith.constant dense<0xFF800000> : vector<2xf32>
    %22 = vector.multi_reduction <maximumf>, %21, %cst_11 [1] : vector<2x32xf32> to vector<2xf32>
    %23 = vector.shape_cast %22 : vector<2xf32> to vector<2x1xf32>
    %24 = vector.broadcast %23 : vector<2x1xf32> to vector<2x32xf32>
    %25 = arith.subf %21, %24 : vector<2x32xf32>
    %26 = math.exp %25 : vector<2x32xf32>
    %cst_12 = arith.constant dense<0.000000e+00> : vector<2xf32>
    %27 = vector.multi_reduction <add>, %26, %cst_12 [1] : vector<2x32xf32> to vector<2xf32>
    %28 = vector.shape_cast %27 : vector<2xf32> to vector<2x1xf32>
    %29 = vector.broadcast %28 : vector<2x1xf32> to vector<2x32xf32>
    %30 = arith.divf %26, %29 : vector<2x32xf32>
    %31 = vector.shape_cast %30 : vector<2x32xf32> to vector<2x1x32xf32>
    %32 = vector.broadcast %31 : vector<2x1x32xf32> to vector<2x4x32xf32>
    %33 = arith.mulf %4, %32 : vector<2x4x32xf32>
    %cst_13 = arith.constant dense<0.000000e+00> : vector<2x4xf32>
    %34 = vector.multi_reduction <add>, %33, %cst_13 [2] : vector<2x4x32xf32> to vector<2x4xf32>
    %c0_14 = arith.constant 0 : index
    %c0_15 = arith.constant 0 : index
    %35 = vector.load %arg4[%c0_14, %c0_15] : memref<2x36xf32, #tpu.memory_space<vmem>>, vector<2x32xf32>
    tpu.vector_store %arg4[%c0_14, %c0_15], %30 {strides = array<i32>} : memref<2x36xf32, #tpu.memory_space<vmem>>, vector<2x32xf32>,
    %c0_16 = arith.constant 0 : index
    %c32 = arith.constant 32 : index
    %36 = vector.load %arg4[%c0_16, %c32] : memref<2x36xf32, #tpu.memory_space<vmem>>, vector<2x4xf32>
    tpu.vector_store %arg4[%c0_16, %c32], %34 {strides = array<i32>} : memref<2x36xf32, #tpu.memory_space<vmem>>, vector<2x4xf32>,
    return
  }
  func.func @transform_0(%arg0: i32) -> (i32, i32, i32) {
    %c0_i32 = arith.constant 0 : i32
    %c0_i32_0 = arith.constant 0 : i32
    %c0_i32_1 = arith.constant 0 : i32
    return %arg0, %c0_i32, %c0_i32_0 : i32, i32, i32
  }
  func.func @transform_1(%arg0: i32) -> (i32, i32) {
    %c0_i32 = arith.constant 0 : i32
    %c0_i32_0 = arith.constant 0 : i32
    return %arg0, %c0_i32 : i32, i32
  }
  func.func @transform_2(%arg0: i32) -> (i32, i32) {
    %c0_i32 = arith.constant 0 : i32
    %c0_i32_0 = arith.constant 0 : i32
    %c0_i32_1 = arith.constant 0 : i32
    return %c0_i32, %c0_i32_0 : i32, i32
  }
  func.func @transform_3(%arg0: i32) -> (i32, i32) {
    %c0_i32 = arith.constant 0 : i32
    %c0_i32_0 = arith.constant 0 : i32
    return %arg0, %c0_i32 : i32, i32
  }
}

</mosaic_0001>

<bundles_post_ra>
// kernel: attention_forward.1
= control target key start
LH: loop header
LB: loop body
LE: loop exit
PB: predicated region body
PF: predicated region fallthrough
CT: control target
= control target key end

     0   :  { %vm128_vm0 = vcmask 1043456   ;;  %vm91_vm1 = vcmask 261120   ;;  %vm115_vm2 = vcmask 31744   ;;  %vm270_vm3 = vcmask 130112   ;;  %s741_s0 = inlined_call_operand.vmem [shape: f32[2,4,32], index: 0, kind: input, shape index: {}]   ;;  %s742_s2 = inlined_call_operand.vmem [shape: f32[80,32], index: 2, kind: input, shape index: {}]   ;;  %s743_s1 = inlined_call_operand.vmem [shape: f32[2,32], index: 1, kind: input, shape index: {}]   ;;  %s744_s3 = inlined_call_operand.vmem [shape: f32[2,36], index: 3, kind: output, shape index: {}]  }
   0x1   :  { %v573_v0 = vld [vmem:[%s741_s0] sm:$0xf]  ;;  %v17_v2 = vld [vmem:[%s742_s2 + $0x18] sm:$0xff]  ;;  %v16_v4 = vld [vmem:[%s742_s2 + $0x10] sm:$0xff]  ;;  %vm274_vm4 = vcmask 195712   ;;  %vm278_vm5 = vcmask 261312  }
   0x2   :  { %26 = vxpose.xlu0.b32.start.end [1/1] (short) (narrow) %v573_v0, 32  ;;  %v18_v1 = vld [vmem:[%s742_s2 + $0x20] sm:$0xff]  ;;  %v15_v5 = vld [vmem:[%s742_s2 + $0x8] sm:$0xff]  ;;  %v20_v24 = vld [vmem:[%s742_s2 + $0x30] sm:$0xff]  ;;  %vm287_vm6 = vcmask 1041409   ;;  %vm290_vm7 = vcmask 254976  }
   0x3   :  { %107 = vmatpush.msra.mxu0 %v18_v1  ;;  %v14_v3 = vld [vmem:[%s742_s2] sm:$0xf]  ;;  %v594_v6 = vld [vmem:[%s741_s0 + $0x4] sm:$0xf]  ;;  %v19_v17 = vld [vmem:[%s742_s2 + $0x28] sm:$0xff] }
   0x4   :  { %495 = vmatpush.msk.msra.mxu1 %vm128_vm0, %v14_v3  ;;  %505 = vmatpush.msk.msra.mxu3 %vm128_vm0, %v14_v3  ;;  %v90_v7 = vld [vmem:[%s743_s1] sm:$0x3]  ;;  %v615_v22 = vld [vmem:[%s742_s2 + $0x48] ss:$0 sm:$0xff]  ;;  %v21_v30 = vld [vmem:[%s742_s2 + $0x38] sm:$0xff] }
   0x5   :  { %108 = vmatpush.msra.mxu0 %v17_v2  ;;  %506 = vmatpush.msk.msra.mxu2 %vm128_vm0, %v14_v3  ;;  %v22_v38 = vld [vmem:[%s742_s2 + $0x40] sm:$0xff] }
   0x6   :  { %500 = vmatpush.msk.msrb.mxu1 %vm128_vm0, %v14_v3  ;;  %vm471_vm0 = vcmask 257024  }
   0x7   :  { %109 = vmatpush.msra.mxu0 %v16_v4 }
   0x9   :  { %110 = vmatpush.msra.mxu0 %v15_v5 }
   0xa   :  { %494 = vmatmul.msk.f32.vlgmr.msra.gmra.mxu0 %vm91_vm1, %v90_v7 }
  0x22   :  { %58 = vxpose.xlu0.b32.start.end [1/1] (short) (narrow) %v594_v6, 32 }
  0x87   :  { %v112_v16 = vpop.f32.mrf.mxu0 }
  0x88   :  { %v204_v18 = vperm.slane %v112_v16, 0  ;;  %v203_v36 = vrot.slane %v112_v16, 1  ;;  %v265_v16 = vlaneseq }
  0x8a   :  { %v205_v40 = vperm.slane %v203_v36, 0 }
  0xa6   :  { %v42_v8 = vpop.trf.xlu0 }
  0xa7   :  { %496 = vmatmul.msk.f32.vlgmr.msra.gmra.mxu1 %vm115_vm2, %v42_v8 }
  0xae   :  { %v43_v9 = vpop.trf.xlu0 }
  0xaf   :  { %497 = vmatmul.msk.f32.vlgmr.msra.gmra.mxu3 %vm115_vm2, %v43_v9 }
  0xb6   :  { %v44_v10 = vpop.trf.xlu0 }
  0xb7   :  { %498 = vmatmul.msk.f32.gmra.mxu3 %vm115_vm2, %v44_v10 }
  0xbe   :  { %v45_v11 = vpop.trf.xlu0 }
  0xbf   :  { %499 = vmatmul.msk.f32.gmra.mxu3 %vm115_vm2, %v45_v11 }
  0xc6   :  { %v74_v12 = vpop.trf.xlu0 }
  0xc7   :  { %501 = vmatmul.msk.f32.vlgmr.msrb.gmra.mxu1 %vm115_vm2, %v74_v12 }
  0xce   :  { %v75_v13 = vpop.trf.xlu0 }
  0xcf   :  { %502 = vmatmul.msk.f32.vlgmr.msra.gmra.mxu2 %vm115_vm2, %v75_v13 }
  0xd6   :  { %v76_v14 = vpop.trf.xlu0 }
  0xd7   :  { %503 = vmatmul.msk.f32.gmra.mxu2 %vm115_vm2, %v76_v14 }
  0xde   :  { %v77_v15 = vpop.trf.xlu0 }
  0xdf   :  { %504 = vmatmul.msk.f32.gmra.mxu2 %vm115_vm2, %v77_v15 }
 0x124   :  { %v149_v19 = vpop.f32.mrf.mxu1 }
 0x125   :  { %v150_v20 = vadd.f32 %v149_v19, %v19_v17 }
 0x127   :  { %v208_v21 = vadd.f32 %v204_v18, %v150_v20 }
 0x129   :  { %513 = vtanh.f32 %v208_v21 }
 0x12f   :  { %v514_v23 = vpop.eup %513 }
 0x130   :  { %v225_v25 = vmul.f32 %v514_v23, %v615_v22 }
 0x132   :  { %v152_v26 = vpop.f32.mrf.mxu3  ;;  %v233_v27 = vsel %vm91_vm1, %v225_v25, 0.0 }
 0x133   :  { %v153_v28 = vadd.f32 %v152_v26, %v20_v24  ;;  %234 = vadd.xlane.f32.xlu1 %v233_v27 }
 0x135   :  { %v209_v29 = vadd.f32 %v204_v18, %v153_v28 }
 0x137   :  { %515 = vtanh.f32 %v209_v29 }
 0x13a   :  { %v155_v31 = vpop.f32.mrf.mxu3 }
 0x13b   :  { %v156_v32 = vadd.f32 %v155_v31, %v21_v30 }
 0x13d   :  { %v516_v33 = vpop.eup %515  ;;  %v210_v34 = vadd.f32 %v204_v18, %v156_v32 }
 0x13e   :  { %v226_v35 = vmul.f32 %v516_v33, %v615_v22 }
 0x13f   :  { %517 = vtanh.f32 %v210_v34 }
 0x140   :  { %v236_v37 = vsel %vm91_vm1, %v226_v35, 0.0 }
 0x141   :  { %237 = vadd.xlane.f32.xlu1 %v236_v37 }
 0x142   :  { %v158_v39 = vpop.f32.mrf.mxu3 }
 0x143   :  { %v159_v41 = vadd.f32 %v158_v39, %v22_v38 }
 0x144   :  { %v190_v42 = vpop.f32.mrf.mxu1 }
 0x145   :  { %v518_v43 = vpop.eup %517  ;;  %v211_v44 = vadd.f32 %v204_v18, %v159_v41  ;;  %v191_v45 = vadd.f32 %v190_v42, %v19_v17  ;;  %v642_v17 = vand.u32 127, %v265_v16 }
 0x146   :  { %v227_v46 = vmul.f32 %v518_v43, %v615_v22 }
 0x147   :  { %519 = vtanh.f32 %v211_v44  ;;  %v212_v47 = vadd.f32 %v205_v40, %v191_v45  ;;  %v645_v19 = vadd.s32 4294967288, %v642_v17  ;;  %v648_v20 = vadd.s32 4294967280, %v642_v17 }
 0x148   :  { %v239_v48 = vsel %vm91_vm1, %v227_v46, 0.0  ;;  %v651_v21 = vadd.s32 4294967272, %v642_v17 }
 0x149   :  { %521 = vtanh.f32 %v212_v47  ;;  %240 = vadd.xlane.f32.xlu1 %v239_v48 }
 0x14d   :  { %v520_v49 = vpop.eup %519 }
 0x14e   :  { %v228_v50 = vmul.f32 %v520_v49, %v615_v22 }
 0x14f   :  { %v522_v51 = vpop.eup %521 }
 0x150   :  { %v242_v52 = vsel %vm91_vm1, %v228_v50, 0.0  ;;  %v229_v53 = vmul.f32 %v522_v51, %v615_v22 }
 0x151   :  { %243 = vadd.xlane.f32.xlu1 %v242_v52 }
 0x152   :  { %v193_v54 = vpop.f32.mrf.mxu2  ;;  %v245_v55 = vsel %vm91_vm1, %v229_v53, 0.0 }
 0x153   :  { %v194_v56 = vadd.f32 %v193_v54, %v20_v24  ;;  %246 = vadd.xlane.f32.xlu2 %v245_v55 }
 0x155   :  { %v213_v57 = vadd.f32 %v205_v40, %v194_v56 }
 0x157   :  { %523 = vtanh.f32 %v213_v57 }
 0x15a   :  { %v196_v58 = vpop.f32.mrf.mxu2 }
 0x15b   :  { %v197_v59 = vadd.f32 %v196_v58, %v21_v30 }
 0x15d   :  { %v524_v60 = vpop.eup %523  ;;  %v214_v61 = vadd.f32 %v205_v40, %v197_v59 }
 0x15e   :  { %v230_v62 = vmul.f32 %v524_v60, %v615_v22 }
 0x15f   :  { %525 = vtanh.f32 %v214_v61 }
 0x160   :  { %v248_v63 = vsel %vm91_vm1, %v230_v62, 0.0 }
 0x161   :  { %249 = vadd.xlane.f32.xlu2 %v248_v63 }
 0x162   :  { %v199_v1 = vpop.f32.mrf.mxu2 }
 0x163   :  { %v200_v2 = vadd.f32 %v199_v1, %v22_v38 }
 0x165   :  { %v526_v3 = vpop.eup %525  ;;  %v215_v4 = vadd.f32 %v205_v40, %v200_v2  ;;  %v549_v40 = vmov 0  }
 0x166   :  { %v231_v5 = vmul.f32 %v526_v3, %v615_v22  ;;  %511 = vset.pattern.permute.xlu1 %v549_v40  ;;  %509 = vset.pattern.permute.xlu2 %v549_v40 }
 0x167   :  { %527 = vtanh.f32 %v215_v4  ;;  %510 = vset.pattern.permute.xlu0 %v549_v40 }
 0x168   :  { %v251_v7 = vsel %vm91_vm1, %v231_v5, 0.0 }
 0x169   :  { %252 = vadd.xlane.f32.xlu2 %v251_v7 }
 0x16d   :  { %v528_v8 = vpop.eup %527 }
 0x16e   :  { %v232_v9 = vmul.f32 %v528_v8, %v615_v22 }
 0x170   :  { %v254_v10 = vsel %vm91_vm1, %v232_v9, 0.0  ;;  %vm488_vm1 = vcmask 288000  }
 0x171   :  { %255 = vadd.xlane.f32.xlu2 %v254_v10 }
 0x1a6   :  { %v235_v11 = vpop.xlane.xlu1 %234 }
 0x1a7   :  { %v267_v27 = vperm.slane %v235_v11, %v642_v17 }
 0x1b4   :  { %v238_v12 = vpop.xlane.xlu1 %237 }
 0x1b5   :  { %v269_v23 = vperm.slane %v238_v12, %v645_v19 }
 0x1b7   :  { %v271_v31 = vsel %vm270_vm3, %v269_v23, %v267_v27 }
 0x1bc   :  { %v241_v15 = vpop.xlane.xlu1 %240 }
 0x1bd   :  { %v273_v25 = vperm.slane %v241_v15, %v648_v20 }
 0x1bf   :  { %v275_v34 = vsel %vm274_vm4, %v273_v25, %v271_v31 }
 0x1c4   :  { %v244_v22 = vpop.xlane.xlu1 %243 }
 0x1c5   :  { %v277_v28 = vperm.slane %v244_v22, %v651_v21 }
 0x1c6   :  { %v247_v13 = vpop.xlane.xlu2 %246 }
 0x1c7   :  { %v280_v29 = vperm.slane %v247_v13, %v642_v17  ;;  %v279_v36 = vsel %vm278_vm5, %v277_v28, %v275_v34 }
 0x1d4   :  { %v250_v14 = vpop.xlane.xlu2 %249 }
 0x1d5   :  { %v281_v24 = vperm.slane %v250_v14, %v645_v19 }
 0x1d7   :  { %v282_v32 = vsel %vm270_vm3, %v281_v24, %v280_v29 }
 0x1dc   :  { %v253_v18 = vpop.xlane.xlu2 %252 }
 0x1dd   :  { %v283_v26 = vperm.slane %v253_v18, %v648_v20 }
 0x1df   :  { %v284_v35 = vsel %vm274_vm4, %v283_v26, %v282_v32 }
 0x1e4   :  { %v256_v30 = vpop.xlane.xlu2 %255 }
 0x1e5   :  { %v285_v33 = vperm.slane %v256_v30, %v651_v21 }
 0x1e7   :  { %v286_v37 = vsel %vm278_vm5, %v285_v33, %v284_v35 }
 0x1e8   :  { %v288_v38 = vsel %vm287_vm6, %v286_v37, %v279_v36 }
 0x1e9   :  { %v291_v39 = vsel %vm290_vm7, %v288_v38, -inf }
 0x1ea   :  { %292 = vmax.xlane.f32.xlu1 %v291_v39 }
 0x25d   :  { %v293_v41 = vpop.xlane.xlu1 %292 }
 0x25e   :  { %v295_v42 = vperm.slane %v293_v41, 0  ;;  %v296_v43 = vperm.slane %v293_v41, 1 }
 0x260   :  { %v299_v44 = vsub.f32 %v235_v11, %v295_v42  ;;  %v300_v45 = vsub.f32 %v238_v12, %v295_v42  ;;  %v303_v46 = vsub.f32 %v247_v13, %v296_v43  ;;  %v304_v49 = vsub.f32 %v250_v14, %v296_v43 }
 0x261   :  { %v305_v51 = vsub.f32 %v253_v18, %v296_v43  ;;  %v301_v55 = vsub.f32 %v241_v15, %v295_v42  ;;  %v306_v58 = vsub.f32 %v256_v30, %v296_v43  ;;  %v302_v61 = vsub.f32 %v244_v22, %v295_v42 }
 0x262   :  { %v307_v47 = vmul.f32 1.442695, %v299_v44  ;;  %v309_v48 = vmul.f32 1.442695, %v300_v45  ;;  %v315_v50 = vmul.f32 1.442695, %v303_v46 }
 0x263   :  { %v317_v52 = vmul.f32 1.442695, %v304_v49  ;;  %v319_v56 = vmul.f32 1.442695, %v305_v51  ;;  %v311_v59 = vmul.f32 1.442695, %v301_v55 }
 0x264   :  { %529 = vpow2.f32 %v307_v47  ;;  %v321_v62 = vmul.f32 1.442695, %v306_v58  ;;  %v313_v1 = vmul.f32 1.442695, %v302_v61 }
 0x265   :  { %531 = vpow2.f32 %v309_v48 }
 0x266   :  { %533 = vpow2.f32 %v315_v50 }
 0x267   :  { %535 = vpow2.f32 %v317_v52 }
 0x268   :  { %537 = vpow2.f32 %v319_v56 }
 0x269   :  { %539 = vpow2.f32 %v311_v59 }
 0x26a   :  { %v669_v53 = vpop.eup %529  ;;  %541 = vpow2.f32 %v321_v62 }
 0x26b   :  { %v671_v54 = vpop.eup %531  ;;  %332 = vperm.xlu2 %509, %v669_v53   ;;  %543 = vpow2.f32 %v313_v1 }
 0x26c   :  { %335 = vperm.xlu0 %510, %v671_v54   ;;  %v675_v57 = vpop.eup %533 }
 0x26d   :  { %344 = vperm.xlu1 %511, %v675_v57   ;;  %v678_v60 = vpop.eup %535 }
 0x26e   :  { %v681_v63 = vpop.eup %537 }
 0x26f   :  { %v684_v2 = vpop.eup %539 }
 0x270   :  { %v687_v3 = vpop.eup %541 }
 0x271   :  { %v544_v4 = vpop.eup %543 }
 0x273   :  { %347 = vperm.xlu2 %509, %v678_v60  }
 0x275   :  { %350 = vperm.xlu1 %511, %v681_v63  }
 0x27b   :  { %338 = vperm.xlu2 %509, %v684_v2  }
 0x27d   :  { %353 = vperm.xlu1 %511, %v687_v3  }
 0x283   :  { %341 = vperm.xlu2 %509, %v544_v4  }
 0x2c5   :  { %v333_v5 = vpop.permute.xlu2 %332 }
 0x2c6   :  { %v355_v13 = vperm.slane %v333_v5, %v642_v17 }
 0x2cd   :  { %v348_v7 = vpop.permute.xlu2 %347 }
 0x2ce   :  { %v363_v23 = vperm.slane %v348_v7, %v645_v19 }
 0x2d5   :  { %v339_v9 = vpop.permute.xlu2 %338 }
 0x2d6   :  { %v358_v16 = vperm.slane %v339_v9, %v648_v20 }
 0x2dd   :  { %v342_v18 = vpop.permute.xlu2 %341 }
 0x2de   :  { %v336_v10 = vpop.permute.xlu0 %335  ;;  %v360_v27 = vperm.slane %v342_v18, %v651_v21 }
 0x2df   :  { %v345_v8 = vpop.permute.xlu1 %344  ;;  %v356_v12 = vperm.slane %v336_v10, %v645_v19 }
 0x2e0   :  { %v362_v14 = vperm.slane %v345_v8, %v642_v17 }
 0x2e1   :  { %v357_v15 = vsel %vm270_vm3, %v356_v12, %v355_v13 }
 0x2e2   :  { %v359_v25 = vsel %vm274_vm4, %v358_v16, %v357_v15  ;;  %v364_v26 = vsel %vm270_vm3, %v363_v23, %v362_v14 }
 0x2e3   :  { %v361_v30 = vsel %vm278_vm5, %v360_v27, %v359_v25 }
 0x2e7   :  { %v351_v11 = vpop.permute.xlu1 %350 }
 0x2e8   :  { %v365_v22 = vperm.slane %v351_v11, %v648_v20 }
 0x2ea   :  { %v366_v29 = vsel %vm274_vm4, %v365_v22, %v364_v26 }
 0x2ef   :  { %v354_v24 = vpop.permute.xlu1 %353 }
 0x2f0   :  { %v367_v28 = vperm.slane %v354_v24, %v651_v21 }
 0x2f2   :  { %v368_v31 = vsel %vm278_vm5, %v367_v28, %v366_v29 }
 0x2f3   :  { %v369_v32 = vsel %vm287_vm6, %v368_v31, %v361_v30 }
 0x2f4   :  { %v371_v33 = vsel %vm290_vm7, %v369_v32, 0.0 }
 0x2f5   :  { %372 = vadd.xlane.f32.xlu2 %v371_v33 }
 0x368   :  { %v373_v34 = vpop.xlane.xlu2 %372 }
 0x369   :  { %v375_v35 = vperm.slane %v373_v34, 0  ;;  %v376_v36 = vperm.slane %v373_v34, 1 }
 0x36b   :  { %545 = vrcp.f32 %v375_v35  ;;  %v390_v41 = vand.u32 2147483648, %v375_v35  ;;  %v388_v44 = vand.u32 2147483647, %v375_v35  ;;  %vm384_vm9 = vweird.f32 %v375_v35 }
 0x36c   :  { %547 = vrcp.f32 %v376_v36  ;;  %v408_v56 = vand.u32 2147483648, %v376_v36  ;;  %vm402_vm13 = vweird.f32 %v376_v36  ;;  %v406_v59 = vand.u32 2147483647, %v376_v36 }
 0x36d   :  { %v391_v46 = vor.u32 1.1754944e-38, %v390_v41  ;;  %vm389_vm11 = vcmp.eq.f32.partialorder %v388_v44, 8.507059e+37 }
 0x36e   :  { %v409_v62 = vor.u32 1.1754944e-38, %v408_v56  ;;  %vm407_vm15 = vcmp.eq.f32.partialorder %v406_v59, 8.507059e+37 }
 0x371   :  { %v546_v37 = vpop.eup %545 }
 0x372   :  { %v380_v38 = vmul.f32 %v546_v37, %v375_v35  ;;  %v548_v39 = vpop.eup %547  ;;  %vm385_vm8 = vweird.f32 %v546_v37 }
 0x373   :  { %v398_v42 = vmul.f32 %v548_v39, %v376_v36  ;;  %vm386_vm10 = vmor %vm384_vm9, %vm385_vm8  ;;  %vm403_vm12 = vweird.f32 %v548_v39 }
 0x374   :  { %v381_v40 = vsub.f32 1.0, %v380_v38  ;;  %vm404_vm14 = vmor %vm402_vm13, %vm403_vm12 }
 0x375   :  { %v399_v47 = vsub.f32 1.0, %v398_v42 }
 0x376   :  { %v382_v43 = vmul.f32 %v546_v37, %v381_v40 }
 0x377   :  { %v400_v52 = vmul.f32 %v548_v39, %v399_v47 }
 0x378   :  { %v383_v45 = vadd.f32 %v546_v37, %v382_v43 }
 0x379   :  { %v401_v55 = vadd.f32 %v548_v39, %v400_v52 }
 0x37a   :  { %v387_v48 = vsel %vm386_vm10, %v546_v37, %v383_v45 }
 0x37b   :  { %v392_v49 = vsel %vm389_vm11, %v391_v46, %v387_v48  ;;  %v405_v61 = vsel %vm404_vm14, %v548_v39, %v401_v55 }
 0x37c   :  { %v396_v50 = vmul.f32 %v544_v4, %v392_v49  ;;  %v393_v51 = vmul.f32 %v669_v53, %v392_v49  ;;  %v394_v58 = vmul.f32 %v671_v54, %v392_v49  ;;  %v410_v1 = vsel %vm407_vm15, %v409_v62, %v405_v61 }
 0x37d   :  { %v411_v4 = vmul.f32 %v675_v57, %v410_v1  ;;  %v412_v53 = vmul.f32 %v678_v60, %v410_v1  ;;  %v395_v5 = vmul.f32 %v684_v2, %v392_v49  ;;  %v413_v7 = vmul.f32 %v681_v63, %v410_v1 }
 0x37e   :  { %433 = vperm.xlu2 %509, %v396_v50   ;;  %424 = vperm.xlu1 %511, %v393_v51   ;;  %v414_v54 = vmul.f32 %v687_v3, %v410_v1 }
 0x386   :  { %427 = vperm.xlu1 %511, %v394_v58  }
 0x38e   :  { %436 = vperm.xlu1 %511, %v411_v4  }
 0x396   :  { %439 = vperm.xlu1 %511, %v412_v53  }
 0x39e   :  { %430 = vperm.xlu1 %511, %v395_v5  }
 0x3a6   :  { %442 = vperm.xlu1 %511, %v413_v7  }
 0x3ae   :  { %445 = vperm.xlu1 %511, %v414_v54  }
 0x3d8   :  { %v434_v57 = vpop.permute.xlu2 %433 }
 0x3d9   :  { %v452_v2 = vperm.slane %v434_v57, %v651_v21 }
 0x3f0   :  { %v425_v8 = vpop.permute.xlu1 %424 }
 0x3f1   :  { %v447_v13 = vperm.slane %v425_v8, %v642_v17 }
 0x3f8   :  { %v428_v9 = vpop.permute.xlu1 %427 }
 0x3f9   :  { %v448_v12 = vperm.slane %v428_v9, %v645_v19 }
 0x3fb   :  { %v449_v63 = vsel %vm270_vm3, %v448_v12, %v447_v13 }
 0x400   :  { %v437_v10 = vpop.permute.xlu1 %436 }
 0x401   :  { %v454_v25 = vperm.slane %v437_v10, %v642_v17 }
 0x408   :  { %v440_v11 = vpop.permute.xlu1 %439 }
 0x409   :  { %v455_v23 = vperm.slane %v440_v11, %v645_v19 }
 0x40b   :  { %v456_v27 = vsel %vm270_vm3, %v455_v23, %v454_v25 }
 0x410   :  { %v431_v60 = vpop.permute.xlu1 %430 }
 0x411   :  { %v450_v14 = vperm.slane %v431_v60, %v648_v20 }
 0x413   :  { %v451_v15 = vsel %vm274_vm4, %v450_v14, %v449_v63 }
 0x414   :  { %v453_v3 = vsel %vm278_vm5, %v452_v2, %v451_v15 }
 0x415   :  { %v469_v16 = vmul.f32 %v453_v3, %v573_v0 }
 0x417   :  { %v472_v18 = vsel %vm471_vm0, %v469_v16, 0.0 }
 0x418   :  { %473 = vadd.xlane.f32.xlu1 %v472_v18  ;;  %v443_v22 = vpop.permute.xlu1 %442 }
 0x419   :  { %v457_v24 = vperm.slane %v443_v22, %v648_v20  ;;  %v483_v20 = vadd.s32 4294967264, %v642_v17 }
 0x41b   :  { %v458_v29 = vsel %vm274_vm4, %v457_v24, %v456_v27 }
 0x420   :  { %v446_v26 = vpop.permute.xlu1 %445 }
 0x421   :  { %v459_v28 = vperm.slane %v446_v26, %v651_v21 }
 0x423   :  { %v460_v30 = vsel %vm278_vm5, %v459_v28, %v458_v29 }
 0x424   :  { %v470_v0 = vmul.f32 %v460_v30, %v594_v6  ;;  %v478_v31 = vsel %vm287_vm6, %v460_v30, %v453_v3 }
 0x425   :  { %480 = vst.msk [vmem:[%s744_s3] sm:$0x3] %vm290_vm7, %v478_v31 }
 0x426   :  { %v475_v19 = vsel %vm471_vm0, %v470_v0, 0.0 }
 0x427   :  { %476 = vadd.xlane.f32.xlu2 %v475_v19 }
 0x48b   :  { %v474_v32 = vpop.xlane.xlu1 %473 }
 0x48c   :  { %v484_v33 = vperm.slane %v474_v32, %v483_v20 }
 0x49a   :  { %v477_v21 = vpop.xlane.xlu2 %476 }
 0x49b   :  { %v485_v34 = vperm.slane %v477_v21, %v483_v20 }
 0x49d   :  { %v486_v35 = vsel %vm287_vm6, %v485_v34, %v484_v33 }
 0x49e   :  { %489 = vst.msk [vmem:[%s744_s3] sm:$0x3] %vm488_vm1, %v486_v35 }

</bundles_post_ra>
